<compile_context>
chip_gen: v7x
topology: tpu7x:2x2x1
jax: 0.10.0
libtpu: 0.0.40
codegen_flags: <defaults>
</compile_context>

<pallas_src>
import functools

import jax
import jax.numpy as jnp
from jax.experimental import pallas as pl
from jax.experimental.pallas import tpu as pltpu

_NUM_SPLITS = 2                       # independent "parallel" chunks of the sample axis
_LANE = 128
_HARD_CAP_LANES = 1024 * _LANE        # 131072 lanes per block max
_TARGET_F32_BYTES = 4 * 1024 * 1024   # ~4 MiB of f32-equivalent logits per block
_VMEM_BUDGET = 36 * 1024 * 1024       # working-set budget (under the 48 MiB scoped limit)


def _cdiv(a, b):
    return -(-a // b)


def _int_pow(x, g):
    """x**g for a non-negative integer g via a trace-time multiply chain (VPU only)."""
    if g == 0:
        return jnp.ones_like(x)
    acc = None
    base = x
    while g:
        if g & 1:
            acc = base if acc is None else acc * base
        g >>= 1
        if g:
            base = base * base
    return acc


def _choose_tile(num_classes, itemsize, m_total):
    """Pick the lane width of one block (samples on lanes, classes on sublanes)."""
    c = max(int(num_classes), 1)
    target = _TARGET_F32_BYTES // (4 * c)
    # rough per-lane VMEM working set:
    #   2x native-dtype input block (double buffered) + ~6 live (C,T) f32/i32
    #   temporaries (x_f32, exp, iota, onehot, two where-selects) + targets
    #   double-buffer + ~12 (1,T) f32 rows.
    per_lane = c * (2 * itemsize + 6 * 4) + 2 * 4 + 12 * 4
    cap = _VMEM_BUDGET // per_lane
    tile = max(_LANE, min(target, cap, _HARD_CAP_LANES))
    del m_total  # the wrapper clamps to the full extent separately
    return (tile // _LANE) * _LANE


def _focal_loss_kernel(logits_ref, targets_ref, out_ref, *,
                       alpha, gamma, ignore_index, valid_m, tile, tiles_per_split):
    s = pl.program_id(1)                          # split along the sample axis
    j = pl.program_id(2)                          # reduction step within the split

    x = logits_ref[...].astype(jnp.float32)       # (C, T): classes on sublanes, samples on lanes
    tgt = targets_ref[...]                        # (1, T) int32

    # numerically stable softmax pieces over the class (sublane) axis
    m = jnp.max(x, axis=0, keepdims=True)                                # (1, T)
    e = jnp.exp(x - m)                                                   # (C, T)  (only exp here)
    sumexp = jnp.sum(e, axis=0, keepdims=True)                           # (1, T)
    lse = m + jnp.log(sumexp)                                            # (1, T)

    # one-hot pick of the target class (iota over sublanes)
    class_ids = jax.lax.broadcasted_iota(jnp.int32, x.shape, 0)          # (C, T)
    onehot = class_ids == tgt
    picked = jnp.sum(jnp.where(onehot, x, 0.0), axis=0, keepdims=True)       # (1, T)
    picked_exp = jnp.sum(jnp.where(onehot, e, 0.0), axis=0, keepdims=True)   # (1, T)

    ce = lse - picked                              # cross-entropy per sample
    pt = picked_exp / sumexp                       # == exp(-ce); reuses e, saves one EUP exp

    if float(gamma) == float(int(gamma)) and gamma >= 0:
        w = _int_pow(1.0 - pt, int(gamma))         # gamma=2 -> a single VPU multiply
    else:
        w = (1.0 - pt) ** jnp.float32(gamma)       # fallback: float-exponent pow (EUP)
    focal = jnp.float32(alpha) * w * ce            # (1, T)

    # Mask by the GLOBAL sample index (handles the partial last block and any
    # clamped/duplicate tail block) and by ignore_index.  Garbage lanes (incl. NaN)
    # are selected away here, never multiplied in.
    gstart = (s * tiles_per_split + j) * tile
    gidx = gstart + jax.lax.broadcasted_iota(jnp.int32, tgt.shape, 1)    # (1, T)
    valid = (gidx < valid_m) & (tgt != ignore_index)
    focal = jnp.where(valid, focal, 0.0)

    # Resident lane-dense accumulator block: init on the first reduction step,
    # element-wise accumulate every step, single HBM writeback when it retires.
    @pl.when(j == 0)
    def _init():
        out_ref[...] = jnp.zeros_like(out_ref)

    out_ref[...] += focal


def focal_loss(inputs, targets, *, alpha=1.0, gamma=2.0,
               size_average=True, ignore_index=255, tile_m=None):
    """Pallas-TPU focal loss.

    inputs : (N, C) or (N, C, *spatial) float logits (native dtype, not upcast here).
    targets: (N,) or (N, *spatial) integer class ids; `ignore_index` gives 0 loss.
    """
    assert inputs.ndim >= 2, "expected (N, C, ...) logits"
    batch = inputs.shape[0]
    num_classes = inputs.shape[1]

    if inputs.ndim == 2:
        # 2-D (N, C): tiny transpose so classes land on sublanes, samples on lanes.
        logits_bcm = inputs.T[None]                               # (1, C, N)
        targets_b1m = targets.reshape(1, 1, -1).astype(jnp.int32)  # (1, 1, N)
    else:
        # (N, C, *spatial): contiguous reshape only — zero extra HBM passes.
        m_spatial = 1
        for d in inputs.shape[2:]:
            m_spatial *= int(d)
        logits_bcm = inputs.reshape(batch, num_classes, m_spatial)          # (B, C, M)
        targets_b1m = targets.reshape(batch, 1, m_spatial).astype(jnp.int32)  # (B, 1, M)

    B, C, M = logits_bcm.shape
    assert targets_b1m.shape == (B, 1, M), "inputs/targets element count mismatch"
    n_elements = B * M                     # mean denominator: ALL elements, incl. ignored

    if tile_m is None:
        tile = _choose_tile(C, logits_bcm.dtype.itemsize, M)
    else:
        tile = max(_LANE, (int(tile_m) // _LANE) * _LANE)

    if tile >= M:
        tile = M                            # full extent (exempt from the /128 rule)
        num_tiles = 1
    else:
        num_tiles = _cdiv(M, tile)

    splits = _NUM_SPLITS if num_tiles >= _NUM_SPLITS else 1
    tiles_per_split = _cdiv(num_tiles, splits)
    last_tile = num_tiles - 1

    def _in_idx(b, s, j):
        # Clamp so every DMA start stays in bounds; the duplicate/partial tail
        # content is zeroed in-kernel via the global-index mask.
        t = jnp.minimum(s * tiles_per_split + j, last_tile)
        return (b, 0, t)

    kernel = functools.partial(
        _focal_loss_kernel,
        alpha=float(alpha), gamma=float(gamma), ignore_index=int(ignore_index),
        valid_m=int(M), tile=int(tile), tiles_per_split=int(tiles_per_split))

    partials = pl.pallas_call(
        kernel,
        out_shape=jax.ShapeDtypeStruct((B * splits, 1, tile), jnp.float32),
        grid=(B, splits, tiles_per_split),
        in_specs=[
            pl.BlockSpec((pl.Squeezed(), C, tile), _in_idx),
            pl.BlockSpec((pl.Squeezed(), 1, tile), _in_idx),
        ],
        out_specs=pl.BlockSpec((pl.Squeezed(), 1, tile),
                               lambda b, s, j: (b * splits + s, 0, 0)),
        compiler_params=pltpu.CompilerParams(
            dimension_semantics=("parallel", "parallel", "arbitrary"),
            vmem_limit_bytes=48 * 1024 * 1024),
    )(logits_bcm, targets_b1m)

    total = jnp.sum(partials)              # single tiny reduction over B*splits*tile f32
    if size_average:
        return total / jnp.float32(n_elements)
    return total


def _focal_loss_ref(inputs, targets, *, alpha=1.0, gamma=2.0,
                    size_average=True, ignore_index=255):
    """Pure-JAX reference mirroring the PyTorch semantics (any rank)."""
    C = inputs.shape[1]
    x = jnp.moveaxis(inputs, 1, -1).reshape(-1, C).astype(jnp.float32)
    t = targets.reshape(-1)
    lse = jax.nn.logsumexp(x, axis=-1)
    safe = jnp.where(t == ignore_index, 0, t).astype(jnp.int32)
    picked = jnp.take_along_axis(x, safe[:, None], axis=-1)[:, 0]
    ce = jnp.where(t == ignore_index, 0.0, lse - picked)
    pt = jnp.exp(-ce)
    focal = alpha * (1.0 - pt) ** gamma * ce
    return focal.mean() if size_average else focal.sum()


if __name__ == "__main__":
    key = jax.random.PRNGKey(0)
    k1, k2, k3, k4, k5, k6 = jax.random.split(key, 6)

    # Case 1: segmentation-style NCHW input (no transpose / no pad path).
    N1, C1, H1, W1 = 2, 4, 16, 16
    logits1 = jax.random.normal(k1, (N1, C1, H1, W1), dtype=jnp.float32)
    targets1 = jax.random.randint(k2, (N1, H1, W1), 0, C1, dtype=jnp.int32)
    targets1 = targets1.at[0, 0, 0].set(255).at[1, 7, 9].set(255)

    loss1 = jax.block_until_ready(focal_loss(logits1, targets1))
    ref1 = _focal_loss_ref(logits1, targets1)
    assert jnp.allclose(loss1, ref1, rtol=1e-5, atol=1e-6), (loss1, ref1)

    # Case 2: plain (N, C) patch-classification input (small transpose path).
    N2, C2 = 64, 8
    logits2 = jax.random.normal(k3, (N2, C2), dtype=jnp.float32)
    targets2 = jax.random.randint(k4, (N2,), 0, C2, dtype=jnp.int32)
    targets2 = targets2.at[3].set(255).at[17].set(255)

    loss2 = jax.block_until_ready(focal_loss(logits2, targets2))
    ref2 = _focal_loss_ref(logits2, targets2)
    assert jnp.allclose(loss2, ref2, rtol=1e-5, atol=1e-6), (loss2, ref2)

    # Case 3: ragged spatial extent + forced small tile -> exercises the multi-tile
    # split, the clamped duplicate tail block and the partial-block masking.
    N3, C3, H3, W3 = 1, 5, 17, 19
    logits3 = jax.random.normal(k5, (N3, C3, H3, W3), dtype=jnp.float32)
    targets3 = jax.random.randint(k6, (N3, H3, W3), 0, C3, dtype=jnp.int32)
    targets3 = targets3.at[0, 0, 0].set(255).at[0, 16, 18].set(255)

    loss3 = jax.block_until_ready(focal_loss(logits3, targets3, tile_m=128))
    ref3 = _focal_loss_ref(logits3, targets3)
    assert jnp.allclose(loss3, ref3, rtol=1e-5, atol=1e-6), (loss3, ref3)

    print("KERNEL_OK")
</pallas_src>

<mosaic_0001>
module attributes {stable_mosaic.version = 11 : i64} {
  func.func @_focal_loss_kernel(%arg0: i32, %arg1: i32, %arg2: i32, %arg3: memref<1x4x256xf32, #tpu.memory_space<vmem>>, %arg4: memref<1x1x256xi32, #tpu.memory_space<vmem>>, %arg5: memref<1x1x256xf32, #tpu.memory_space<vmem>>) attributes {dimension_semantics = [#tpu.dimension_semantics<parallel>, #tpu.dimension_semantics<parallel>, #tpu.dimension_semantics<arbitrary>], iteration_bounds = array<i64: 2, 1, 1>, scalar_prefetch = 0 : i64, scratch_operands = 0 : i64, tpu.core_type = #tpu.core_type<tc>, window_params = [{transform_indices = @transform_0, window_bounds = array<i64: 1, 4, 256>}, {transform_indices = @transform_1, window_bounds = array<i64: 1, 1, 256>}, {transform_indices = @transform_2, window_bounds = array<i64: 1, 1, 256>}]} {
    %c0 = arith.constant 0 : index
    %c0_0 = arith.constant 0 : index
    %c0_1 = arith.constant 0 : index
    %0 = vector.load %arg3[%c0, %c0_0, %c0_1] : memref<1x4x256xf32, #tpu.memory_space<vmem>>, vector<1x4x256xf32>
    %1 = vector.shape_cast %0 : vector<1x4x256xf32> to vector<4x256xf32>
    %c0_2 = arith.constant 0 : index
    %c0_3 = arith.constant 0 : index
    %c0_4 = arith.constant 0 : index
    %2 = vector.load %arg4[%c0_2, %c0_3, %c0_4] : memref<1x1x256xi32, #tpu.memory_space<vmem>>, vector<1x1x256xi32>
    %3 = vector.shape_cast %2 : vector<1x1x256xi32> to vector<1x256xi32>
    %cst = arith.constant dense<0xFF800000> : vector<256xf32>
    %4 = vector.multi_reduction <maximumf>, %1, %cst [0] : vector<4x256xf32> to vector<256xf32>
    %5 = vector.shape_cast %4 : vector<256xf32> to vector<1x256xf32>
    %6 = vector.broadcast %5 : vector<1x256xf32> to vector<4x256xf32>
    %7 = arith.subf %1, %6 : vector<4x256xf32>
    %8 = math.exp %7 : vector<4x256xf32>
    %cst_5 = arith.constant dense<0.000000e+00> : vector<256xf32>
    %9 = vector.multi_reduction <add>, %8, %cst_5 [0] : vector<4x256xf32> to vector<256xf32>
    %10 = vector.shape_cast %9 : vector<256xf32> to vector<1x256xf32>
    %11 = math.log %10 : vector<1x256xf32>
    %12 = arith.addf %5, %11 : vector<1x256xf32>
    %13 = tpu.iota {dimensions = array<i32: 0>} : vector<4x256xi32>
    %14 = vector.broadcast %3 : vector<1x256xi32> to vector<4x256xi32>
    %15 = arith.cmpi eq, %13, %14 : vector<4x256xi32>
    %cst_6 = arith.constant 0.000000e+00 : f32
    %16 = vector.broadcast %cst_6 : f32 to vector<4x256xf32>
    %17 = arith.select %15, %1, %16 : vector<4x256xi1>, vector<4x256xf32>
    %cst_7 = arith.constant dense<0.000000e+00> : vector<256xf32>
    %18 = vector.multi_reduction <add>, %17, %cst_7 [0] : vector<4x256xf32> to vector<256xf32>
    %19 = vector.shape_cast %18 : vector<256xf32> to vector<1x256xf32>
    %cst_8 = arith.constant 0.000000e+00 : f32
    %20 = vector.broadcast %cst_8 : f32 to vector<4x256xf32>
    %21 = arith.select %15, %8, %20 : vector<4x256xi1>, vector<4x256xf32>
    %cst_9 = arith.constant dense<0.000000e+00> : vector<256xf32>
    %22 = vector.multi_reduction <add>, %21, %cst_9 [0] : vector<4x256xf32> to vector<256xf32>
    %23 = vector.shape_cast %22 : vector<256xf32> to vector<1x256xf32>
    %24 = arith.subf %12, %19 : vector<1x256xf32>
    %25 = arith.divf %23, %10 : vector<1x256xf32>
    %cst_10 = arith.constant 1.000000e+00 : f32
    %26 = vector.broadcast %cst_10 : f32 to vector<1x256xf32>
    %27 = arith.subf %26, %25 : vector<1x256xf32>
    %28 = arith.mulf %27, %27 : vector<1x256xf32>
    %cst_11 = arith.constant 1.000000e+00 : f32
    %29 = vector.broadcast %cst_11 : f32 to vector<1x256xf32>
    %30 = arith.mulf %29, %28 : vector<1x256xf32>
    %31 = arith.mulf %30, %24 : vector<1x256xf32>
    %c1_i32 = arith.constant 1 : i32
    %32 = arith.muli %arg1, %c1_i32 : i32
    %33 = arith.addi %32, %arg2 : i32
    %c256_i32 = arith.constant 256 : i32
    %34 = arith.muli %33, %c256_i32 : i32
    %35 = tpu.iota {dimensions = array<i32: 1>} : vector<1x256xi32>
    %36 = vector.broadcast %34 : i32 to vector<1x256xi32>
    %37 = arith.addi %36, %35 : vector<1x256xi32>
    %c256_i32_12 = arith.constant 256 : i32
    %38 = vector.broadcast %c256_i32_12 : i32 to vector<1x256xi32>
    %39 = arith.cmpi slt, %37, %38 : vector<1x256xi32>
    %c255_i32 = arith.constant 255 : i32
    %40 = vector.broadcast %c255_i32 : i32 to vector<1x256xi32>
    %41 = arith.cmpi ne, %3, %40 : vector<1x256xi32>
    %42 = arith.andi %39, %41 : vector<1x256xi1>
    %cst_13 = arith.constant 0.000000e+00 : f32
    %43 = vector.broadcast %cst_13 : f32 to vector<1x256xf32>
    %44 = arith.select %42, %31, %43 : vector<1x256xi1>, vector<1x256xf32>
    %c0_i32 = arith.constant 0 : i32
    %45 = arith.cmpi eq, %arg2, %c0_i32 : i32
    %46 = arith.extui %45 : i1 to i32
    %c0_i32_14 = arith.constant 0 : i32
    %47 = arith.cmpi ne, %46, %c0_i32_14 : i32
    scf.if %47 {
      %cst_21 = arith.constant 0.000000e+00 : f32
      %54 = vector.broadcast %cst_21 : f32 to vector<1x256xf32>
      %c0_22 = arith.constant 0 : index
      %c0_23 = arith.constant 0 : index
      %c0_24 = arith.constant 0 : index
      %55 = vector.load %arg5[%c0_22, %c0_23, %c0_24] : memref<1x1x256xf32, #tpu.memory_space<vmem>>, vector<1x1x256xf32>
      %56 = vector.shape_cast %55 : vector<1x1x256xf32> to vector<1x256xf32>
      %57 = vector.shape_cast %54 : vector<1x256xf32> to vector<1x1x256xf32>
      tpu.vector_store %arg5[%c0_22, %c0_23, %c0_24], %57 {strides = array<i32>} : memref<1x1x256xf32, #tpu.memory_space<vmem>>, vector<1x1x256xf32>,
    } else {
    }
    %c0_15 = arith.constant 0 : index
    %c0_16 = arith.constant 0 : index
    %c0_17 = arith.constant 0 : index
    %48 = vector.load %arg5[%c0_15, %c0_16, %c0_17] : memref<1x1x256xf32, #tpu.memory_space<vmem>>, vector<1x1x256xf32>
    %49 = vector.shape_cast %48 : vector<1x1x256xf32> to vector<1x256xf32>
    %50 = arith.addf %49, %44 : vector<1x256xf32>
    %c0_18 = arith.constant 0 : index
    %c0_19 = arith.constant 0 : index
    %c0_20 = arith.constant 0 : index
    %51 = vector.load %arg5[%c0_18, %c0_19, %c0_20] : memref<1x1x256xf32, #tpu.memory_space<vmem>>, vector<1x1x256xf32>
    %52 = vector.shape_cast %51 : vector<1x1x256xf32> to vector<1x256xf32>
    %53 = vector.shape_cast %50 : vector<1x256xf32> to vector<1x1x256xf32>
    tpu.vector_store %arg5[%c0_18, %c0_19, %c0_20], %53 {strides = array<i32>} : memref<1x1x256xf32, #tpu.memory_space<vmem>>, vector<1x1x256xf32>,
    return
  }
  func.func @transform_0(%arg0: i32, %arg1: i32, %arg2: i32) -> (i32, i32, i32) {
    %c1_i32 = arith.constant 1 : i32
    %0 = arith.muli %arg1, %c1_i32 : i32
    %1 = arith.addi %0, %arg2 : i32
    %c0_i32 = arith.constant 0 : i32
    %2 = arith.minsi %1, %c0_i32 : i32
    %c0_i32_0 = arith.constant 0 : i32
    %c0_i32_1 = arith.constant 0 : i32
    return %arg0, %c0_i32_0, %2 : i32, i32, i32
  }
  func.func @transform_1(%arg0: i32, %arg1: i32, %arg2: i32) -> (i32, i32, i32) {
    %c1_i32 = arith.constant 1 : i32
    %0 = arith.muli %arg1, %c1_i32 : i32
    %1 = arith.addi %0, %arg2 : i32
    %c0_i32 = arith.constant 0 : i32
    %2 = arith.minsi %1, %c0_i32 : i32
    %c0_i32_0 = arith.constant 0 : i32
    %c0_i32_1 = arith.constant 0 : i32
    return %arg0, %c0_i32_0, %2 : i32, i32, i32
  }
  func.func @transform_2(%arg0: i32, %arg1: i32, %arg2: i32) -> (i32, i32, i32) {
    %c1_i32 = arith.constant 1 : i32
    %0 = arith.muli %arg0, %c1_i32 : i32
    %1 = arith.addi %0, %arg1 : i32
    %c0_i32 = arith.constant 0 : i32
    %c0_i32_0 = arith.constant 0 : i32
    %c0_i32_1 = arith.constant 0 : i32
    return %1, %c0_i32, %c0_i32_0 : i32, i32, i32
  }
}

</mosaic_0001>

<bundles_post_ra>
// kernel: tpu_custom_call.1
= control target key start
LH: loop header
LB: loop body
LE: loop exit
PB: predicated region body
PF: predicated region fallthrough
CT: control target
= control target key end

     0   :  { %7 = vsyncpa [#allocation3], 0  ;;  %s1082_s0 = inlined_call_operand.hbm [shape: f32[2,4,256], index: 0, kind: input, shape index: {}]   ;;  %s1083_s1 = inlined_call_operand.hbm [shape: s32[2,1,256], index: 1, kind: input, shape index: {}]   ;;  %s1084_s2 = inlined_call_operand.hbm [shape: f32[2,1,256], index: 2, kind: output, shape index: {}]  }
   0x1   :  { %9 = vsyncpa [#allocation3 + $0x1], 0 }
   0x2   :  { %10 = vsyncpa [#allocation6], 0 }
   0x3   :  { %12 = vsyncpa [#allocation6 + $0x1], 0 }
   0x4   :  { %13 = vsyncpa [#allocation4], 0 }
   0x5   :  { %15 = vsyncpa [#allocation4 + $0x1], 0  ;;  %s819_s9 = smov 0   ;;  %s821_s10 = smov 0  }
   0x6   :  { %s823_s11 = smov 0   ;;  %s825_s12 = smov 0  }
   0x7   :  { %s827_s13 = smov 0   ;;  %s829_s14 = smov 0  }
   0x8 LB: > { %s547_s15 = sadd.s32 4294967295, %s796_s14   ;;  %s548_s16 = sadd.s32 4294967294, %s796_s14   ;;  %s796_s14 = sphi %s829_s14, %s21_s14   ;;  %s792_s13 = sphi %s827_s13, %s1106_s13   ;;  %s788_s12 = sphi %s825_s12, %s1105_s12   ;;  %s784_s11 = sphi %s823_s11, %s1104_s11   ;;  %s780_s10 = sphi %s821_s10, %s1103_s10   ;;  %s776_s9 = sphi %s819_s9, %s1102_s9  }
   0x9   : > { %s40_s17 = sadd.s32 1, %s792_s13  ;;  %s55_s18 = sadd.s32 1, %s784_s11 }
   0xa   : > { %p42_p0 = scmp.ge.s32.totalorder %s40_s17, 2  ;;  %p62_p1 = scmp.ne.s32.totalorder %s784_s11, %s780_s10 }
   0xb   : > { %p63_p2 = scmp.eq.s32.totalorder %s796_s14, 0  ;;  %p68_p3 = scmp.ne.s32.totalorder %s780_s10, %s776_s9 }
   0xc   : > { %s1108_s17 = smov (%p42_p0, %s40_s17), 0  ;;  %p69_p5 = scmp.eq.s32.totalorder %s547_s15, 0 }
   0xd   : > { %p860_p4 = por %p63_p2, %p62_p1  ;;  %s50_s20 = ssub.s32 %s792_s13, %s1108_s17 }
   0xe   : > { %p128_p6 = scmp.eq.s32.totalorder %s547_s15, 1  ;;  %p53_p7 = scmp.eq.s32.totalorder %s50_s20, 0 }
   0xf   : > { %p866_p8 = por %p69_p5, %p68_p3  ;;  %p134_p10 = scmp.eq.s32.totalorder %s548_s16, 1 }
  0x10   : > { %p870_p9 = por %p128_p6, %p62_p1  ;;  %p586_p13 = scmp.lt.s32.totalorder %s796_s14, 2 }
  0x11   : > { %s1088_s21 = scalar_select %p866_p8, 1, 0 }
  0x12   : > { %s1089_s22 = scalar_select %p870_p9, 1, 0 }
  0x13   : > { %s875_s23 = scalar_select %p53_p7, %s784_s11, %s55_s18  }
  0x14   : > { %p877_p11 = por %p134_p10, %p68_p3  ;;  %s884_s25 = sand.u32 1, %s784_s11  }
  0x15   : > { %s551_s26 = sshll.u32 %s884_s25, 3  ;;  %s566_s27 = sshll.u32 %s792_s13, 7 }
  0x16   : > { %s1090_s24 = scalar_select %p877_p11, 1, 0 }
  0x17   : > { %s891_s30 = scalar_lea.hbm %s1082_s0, %s566_s27  ;;  %s158_s3 = scalar_lea.vmem [#allocation2], %s551_s26 }
  0x18   : > { %s171_s4 = sshll.u32 %s158_s3, 4  ;;  %p897_p0 = pnand %p586_p13, %p860_p4  ;;  %s893_s4 = int_to_ptr.vmem [resolvable:$true] %s171_s4 }
  0x19   : > { %s155_s6 = scalar_lea.sflag [#allocation3], %s884_s25  ;;  %s650_s7 = scalar_lea.hbm %s891_s30, 128 }
  0x1a   : > { %p651_p3 = scmp.ne.s32.totalorder %s891_s30, %s650_s7  ;;  %p652_p5 = pneg %p897_p0 }
  0x1b   : > { %s655_s16 = scalar_lea.hbm %s1082_s0, 256  ;;  %p656_p4 = scmp.lt.u32.totalorder %s891_s30, %s1082_s0 }
  0x1c   : > { %p653_p6 = pnand %p652_p5, %p651_p3  ;;  %p657_p10 = scmp.lt.u32.totalorder %s655_s16, %s650_s7 }
  0x1d   : > { %p659_p12 = scmp.lt.u32.totalorder %s650_s7, %s891_s30 }
  0x1e   : > { %p654_p7 = pneg %p653_p6  ;;  %p658_p13 = por %p657_p10, %p656_p4 }
  0x20   : > { %p660_p1 = por %p659_p12, %p658_p13 }
  0x22   : > { %p661_p2 = pnand %p660_p1, %p654_p7 }
  0x24   : > { %664 = shalt.err (!%p661_p2)
}
  0x25   : > { %s665_s20 = scalar_lea.vmem %s893_s4, 128  ;;  %s798_s26 = smov [#allocation2]  }
  0x26   : > { %p666_p3 = scmp.ne.s32.totalorder %s893_s4, %s665_s20  ;;  %s670_s27 = sshll.u32 %s798_s26, 4  ;;  %s671_s27 = int_to_ptr.vmem [resolvable:$false] %s670_s27 }
  0x27   : > { %s672_s28 = scalar_lea.vmem %s671_s27, 256  ;;  %p673_p9 = scmp.lt.s32.totalorder %s893_s4, %s671_s27 }
  0x28   : > { %p668_p6 = pnand %p666_p3, %p652_p5  ;;  %p674_p4 = scmp.lt.s32.totalorder %s672_s28, %s665_s20 }
  0x2a   : > { %p669_p11 = pneg %p668_p6  ;;  %p675_p10 = por %p674_p4, %p673_p9 }
  0x2c   : > { %p676_p12 = pnand %p675_p10, %p669_p11 }
  0x2e   : > { %679 = shalt.err (!%p676_p12)
}
  0x2f   : > { %578 = dma.hbm_to_vmem [thread:$0]  (!%p897_p0), %s891_s30, 128, %s893_s4, %s155_s6  }
  0x30   : > { %p1092_p1 = scmp.lt.s32.totalorder %s796_s14, 3  ;;  %p1093_p2 = scmp.ge.s32.totalorder %s796_s14, 1 }
  0x31   : > { %s554_s3 = sshll.u32 %s884_s25, 1  ;;  %s567_s7 = sshll.u32 %s792_s13, 5 }
  0x32   : > { %p933_p7 = pnand %p1093_p2, %p1092_p1  ;;  %s942_s16 = scalar_lea.hbm %s1083_s1, %s567_s7 }
  0x33   : > { %s182_s18 = scalar_lea.vmem [#allocation5], %s554_s3  ;;  %s179_s30 = scalar_lea.sflag [#allocation6], %s884_s25 }
  0x34   : > { %s1094_s29 = scalar_select %p933_p7, 1, 0 }
  0x35   : > { %s195_s19 = sshll.u32 %s182_s18, 4  ;;  %s680_s4 = scalar_lea.hbm %s942_s16, 32  ;;  %s196_s19 = int_to_ptr.vmem [resolvable:$true] %s195_s19 }
  0x36   : > { %p681_p9 = scmp.ne.s32.totalorder %s942_s16, %s680_s4  ;;  %s685_s26 = scalar_lea.hbm %s1083_s1, 64 }
  0x37   : > { %p686_p3 = scmp.lt.u32.totalorder %s942_s16, %s1083_s1  ;;  %p687_p6 = scmp.lt.u32.totalorder %s685_s26, %s680_s4 }
  0x38   : > { %p683_p11 = pnand %p681_p9, %p652_p5  ;;  %p689_p10 = scmp.lt.u32.totalorder %s680_s4, %s942_s16 }
  0x39   : > { %p688_p4 = por %p687_p6, %p686_p3 }
  0x3a   : > { %p684_p13 = pneg %p683_p11 }
  0x3b   : > { %p690_p12 = por %p689_p10, %p688_p4 }
  0x3d   : > { %p691_p1 = pnand %p690_p12, %p684_p13 }
  0x3f   : > { %694 = shalt.err (!%p691_p1)
}
  0x40   : > { %s695_s25 = scalar_lea.vmem %s196_s19, 32  ;;  %s799_s3 = smov [#allocation5]  }
  0x41   : > { %p696_p2 = scmp.ne.s32.totalorder %s196_s19, %s695_s25  ;;  %s700_s7 = sshll.u32 %s799_s3, 4  ;;  %s701_s7 = int_to_ptr.vmem [resolvable:$false] %s700_s7 }
  0x42   : > { %s702_s8 = scalar_lea.vmem %s701_s7, 64  ;;  %p703_p8 = scmp.lt.s32.totalorder %s196_s19, %s701_s7 }
  0x43   : > { %p698_p9 = pnand %p696_p2, %p652_p5  ;;  %p704_p7 = scmp.lt.s32.totalorder %s702_s8, %s695_s25 }
  0x45   : > { %p699_p11 = pneg %p698_p9  ;;  %p705_p3 = por %p704_p7, %p703_p8 }
  0x47   : > { %p706_p6 = pnand %p705_p3, %p699_p11 }
  0x49   : > { %709 = shalt.err (!%p706_p6)
}
  0x4a   : > { %581 = dma.hbm_to_vmem [thread:$0]  (!%p897_p0), %s942_s16, 32, %s196_s19, %s179_s30  }
  0x4b   : > { %p1095_p13 = scmp.ne.s32.totalorder %s1094_s29, 0 }
  0x4c   : > { %s967_s15 = sand.u32 (!%p1095_p13), 1, %s780_s10   ;;  %p1096_p5 = scmp.ne.s32.totalorder (!%p1095_p13), %s1088_s21, 0 }
  0x4d   : > { %204 = sbr.rel (%p1095_p13) target bundleno = 179 (0xb3), region = 28  ;;  %s558_s18 = sshll.u32 (!%p1095_p13), %s967_s15, 3 }
  0x4e   : > { %s207_s4 = scalar_lea.sflag (!%p1095_p13), [#allocation3], %s967_s15  ;;  %s210_s6 = scalar_lea.vmem (!%p1095_p13), [#allocation2], %s558_s18 }
  0x54   : > { %763 = dma.done.wait (%p1096_p5), %s207_s4, 128  }
  0x55   : > { %765 = vsyncadd (%p1096_p5), %s207_s4, 4294967168  ;;  %s559_s5 = sshll.u32 %s967_s15, 1  ;;  %s216_s29 = scalar_lea.sflag [#allocation6], %s967_s15 }
  0x56   : > { %s977_s16 = scalar_lea.vmem [#allocation5], %s559_s5 }
  0x57   : > { %767 = dma.done.wait (%p1096_p5), %s216_s29, 32  }
  0x58   : > { %769 = vsyncadd (%p1096_p5), %s216_s29, 4294967264  ;;  %v304_v0 = vlaneseq  ;;  %s987_s19 = scalar_lea.vmem [#allocation7], %s559_s5  ;;  %v800_v2 = vmov 0.0   ;;  %vm259_vm1 = vcmask 1043456   ;;  %v254_v3 = vld [vmem:[%s210_s6] sm:$0xff]  ;;  %s568_s21 = sshll.u32 %s788_s12, 5 }
  0x59   : > { %v257_v4 = vcombine.high %v254_v3, %v254_v3  ;;  %v260_v5 = vsel %vm259_vm1, %v254_v3, -inf  ;;  %v255_v24 = vld [vmem:[%s977_s16] sm:$0x3]  ;;  %s436_s30 = sshll.u32 %s987_s19, 4  ;;  %s1030_s27 = scalar_lea.hbm %s1084_s2, %s568_s21  ;;  %s1032_s30 = int_to_ptr.vmem [resolvable:$true] %s436_s30 }
  0x5a   : > { %vm983_vm0 = vcmp.lt.s32.totalorder %v304_v0, 256  ;;  %v261_v6 = vrot.slane %v260_v5, 4  ;;  %v1000_v21 = vshrl.u32 %v304_v0, 7  ;;  %vm370_vm4 = vcmp.ne.s32.totalorder %v255_v24, 255  ;;  %s421_s28 = scalar_lea.sflag [#allocation4], %s967_s15  ;;  %s710_s25 = scalar_lea.vmem %s1032_s30, 32 }
  0x5b   : > { %394 = vst.msk [vmem:[%s987_s19] sm:$0x3] %vm983_vm0, %v800_v2  ;;  %v267_v7 = vsel %vm259_vm1, %v257_v4, -inf  ;;  %p711_p8 = scmp.ne.s32.totalorder %s1032_s30, %s710_s25  ;;  %p1099_p0 = scmp.ne.s32.totalorder %s1089_s22, 0 }
  0x5c   : > { %v262_v8 = vmax.f32 %v260_v5, %v261_v6  ;;  %v268_v9 = vrot.slane %v267_v7, 4  ;;  %v308_v23 = vsub.s32 0, %v1000_v21  ;;  %v312_v25 = vsub.s32 1, %v1000_v21  ;;  %s803_s12 = smov [#allocation7]  }
  0x5d   : > { %p712_p7 = pnand %p711_p8, %p1099_p0  ;;  %s714_s3 = sshll.u32 %s803_s12, 4  ;;  %s715_s3 = int_to_ptr.vmem [resolvable:$false] %s714_s3 }
  0x5e   : > { %v263_v10 = vrot.slane %v262_v8, 2  ;;  %v269_v11 = vmax.f32 %v267_v7, %v268_v9  ;;  %v309_v26 = vrot.slane %v255_v24, %v308_v23  ;;  %v313_v27 = vrot.slane %v255_v24, %v312_v25  ;;  %s716_s7 = scalar_lea.vmem %s715_s3, 64  ;;  %p717_p10 = scmp.lt.s32.totalorder %s1032_s30, %s715_s3 }
  0x5f   : > { %p713_p4 = pneg %p712_p7  ;;  %p718_p12 = scmp.lt.s32.totalorder %s716_s7, %s710_s25 }
  0x60   : > { %v264_v12 = vmax.f32 %v262_v8, %v263_v10  ;;  %v270_v13 = vrot.slane %v269_v11, 2  ;;  %vm314_vm2 = vcmp.eq.s32.totalorder %v1000_v21, %v309_v26  ;;  %vm315_vm3 = vcmp.eq.s32.totalorder %v1000_v21, %v313_v27 }
  0x61   : > { %v316_v28 = vsel %vm314_vm2, %v254_v3, 0.0  ;;  %v317_v32 = vsel %vm315_vm3, %v257_v4, 0.0  ;;  %p719_p1 = por %p718_p12, %p717_p10 }
  0x62   : > { %v265_v14 = vrot.slane %v264_v12, 1  ;;  %v271_v15 = vmax.f32 %v269_v11, %v270_v13  ;;  %v318_v35 = vsel %vm259_vm1, %v316_v28, 0.0  ;;  %v325_v42 = vsel %vm259_vm1, %v317_v32, 0.0 }
  0x63   : > { %v319_v44 = vrot.slane %v318_v35, 4  ;;  %v326_v49 = vrot.slane %v325_v42, 4  ;;  %p720_p2 = pnand %p719_p1, %p713_p4 }
  0x64   : > { %v994_v16 = vmax.f32 %v264_v12, %v265_v14  ;;  %v272_v17 = vrot.slane %v271_v15, 1  ;;  %v801_v12 = vmov 0  }
  0x65   : > { %v320_v53 = vadd.f32 %v319_v44, %v318_v35  ;;  %v327_v57 = vadd.f32 %v326_v49, %v325_v42  ;;  %v371_v13 = vsel %vm370_vm4, 1, %v801_v12  ;;  %v395_v44 = vld [vmem:[%s987_s19] sm:$0x3] }
  0x66   : > { %v996_v18 = vmax.f32 %v271_v15, %v272_v17  ;;  %v375_v24 = vrot.slane %v371_v13, %v308_v23  ;;  %v379_v35 = vrot.slane %v371_v13, %v312_v25 }
  0x67   : > { %v321_v61 = vrot.slane %v320_v53, 2  ;;  %v328_v0 = vrot.slane %v327_v57, 2 }
  0x68   : > { %v276_v19 = vcombine.low %v994_v16, %v996_v18  ;;  %vm380_vm5 = vcmp.ne.s32.totalorder %v375_v24, 0  ;;  %vm381_vm6 = vcmp.ne.s32.totalorder %v379_v35, 0 }
  0x69   : > { %v329_v5 = vadd.f32 %v328_v0, %v327_v57 }
  0x6a   : > { %v278_v20 = vsub.f32 %v254_v3, %v276_v19  ;;  %v322_v3 = vadd.f32 %v321_v61, %v320_v53 }
  0x6b   : > { %v330_v9 = vrot.slane %v329_v5, 1 }
  0x6c   : > { %v279_v22 = vmul.f32 1.442695, %v278_v20  ;;  %v323_v7 = vrot.slane %v322_v3, 1 }
  0x6e   : > { %640 = vpow2.f32 %v279_v22  ;;  %v324_v17 = vadd.f32 %v323_v7, %v322_v3  ;;  %v802_v22 = vmov 1966171168  }
  0x6f   : > { %v400_v26 = vunpack.c.l.s4 %v802_v22 }
  0x78   : > { %v641_v29 = vpop.eup %640 }
  0x79   : > { %v282_v30 = vcombine.high %v641_v29, %v641_v29  ;;  %v284_v31 = vsel %vm259_vm1, %v641_v29, 0.0  ;;  %v332_v33 = vsel %vm314_vm2, %v641_v29, 0.0 }
  0x7a   : > { %v285_v34 = vrot.slane %v284_v31, 4  ;;  %v334_v36 = vsel %vm259_vm1, %v332_v33, 0.0 }
  0x7b   : > { %v291_v37 = vsel %vm259_vm1, %v282_v30, 0.0  ;;  %v333_v38 = vsel %vm315_vm3, %v282_v30, 0.0  ;;  %v335_v39 = vrot.slane %v334_v36, 4  ;;  %v331_v30 = vadd.f32 %v330_v9, %v329_v5 }
  0x7c   : > { %v286_v40 = vadd.f32 %v285_v34, %v284_v31  ;;  %v292_v41 = vrot.slane %v291_v37, 4  ;;  %v341_v43 = vsel %vm259_vm1, %v333_v38, 0.0 }
  0x7d   : > { %v342_v45 = vrot.slane %v341_v43, 4  ;;  %v336_v48 = vadd.f32 %v335_v39, %v334_v36 }
  0x7e   : > { %v287_v46 = vrot.slane %v286_v40, 2  ;;  %v293_v47 = vadd.f32 %v292_v41, %v291_v37 }
  0x7f   : > { %v343_v52 = vadd.f32 %v342_v45, %v341_v43  ;;  %v337_v56 = vrot.slane %v336_v48, 2 }
  0x80   : > { %v288_v50 = vadd.f32 %v287_v46, %v286_v40  ;;  %v294_v51 = vrot.slane %v293_v47, 2 }
  0x81   : > { %v344_v60 = vrot.slane %v343_v52, 2  ;;  %v338_v63 = vadd.f32 %v337_v56, %v336_v48 }
  0x82   : > { %v289_v54 = vrot.slane %v288_v50, 1  ;;  %v295_v55 = vadd.f32 %v294_v51, %v293_v47 }
  0x83   : > { %v345_v2 = vadd.f32 %v344_v60, %v343_v52  ;;  %v339_v4 = vrot.slane %v338_v63, 1 }
  0x84   : > { %v290_v58 = vadd.f32 %v289_v54, %v288_v50  ;;  %v296_v59 = vrot.slane %v295_v55, 1 }
  0x85   : > { %v346_v6 = vrot.slane %v345_v2, 1  ;;  %v340_v8 = vadd.f32 %v339_v4, %v338_v63 }
  0x86   : > { %v297_v62 = vadd.f32 %v296_v59, %v295_v55  ;;  %642 = vlog2.f32 %v290_v58 }
  0x87   : > { %644 = vrcp.f32 %v290_v58  ;;  %v347_v11 = vadd.f32 %v346_v6, %v345_v2 }
  0x88   : > { %646 = vlog2.f32 %v297_v62 }
  0x89   : > { %648 = vrcp.f32 %v297_v62 }
  0x90   : > { %v643_v10 = vpop.eup %642 }
  0x91   : > { %v645_v14 = vpop.eup %644  ;;  %v299_v15 = vmul.f32 0.6931472, %v643_v10 }
  0x92   : > { %v647_v19 = vpop.eup %646  ;;  %v351_v20 = vmul.f32 %v645_v14, %v340_v8 }
  0x93   : > { %v649_v27 = vpop.eup %648  ;;  %v301_v28 = vmul.f32 0.6931472, %v647_v19  ;;  %v302_v29 = vadd.f32 %v299_v15, %v994_v16  ;;  %v401_v16 = vunpack.c.0.s8 %v400_v26 }
  0x94   : > { %v353_v31 = vmul.f32 %v649_v27, %v347_v11  ;;  %v354_v32 = vsub.f32 1.0, %v351_v20 }
  0x95   : > { %v303_v33 = vadd.f32 %v301_v28, %v996_v18  ;;  %v348_v34 = vsub.f32 %v302_v29, %v324_v17  ;;  %v404_v18 = vsub.s32 %v401_v16, %v1000_v21 }
  0x96   : > { %v355_v36 = vsub.f32 1.0, %v353_v31  ;;  %v356_v37 = vmul.f32 %v354_v32, %v354_v32 }
  0x97   : > { %v349_v38 = vsub.f32 %v303_v33, %v331_v30 }
  0x98   : > { %v357_v39 = vmul.f32 %v355_v36, %v355_v36  ;;  %v358_v40 = vmul.f32 %v356_v37, %v348_v34 }
  0x9a   : > { %v359_v23 = vmul.f32 %v357_v39, %v349_v38  ;;  %v384_v41 = vsel %vm380_vm5, %v358_v40, 0.0 }
  0x9c   : > { %v385_v42 = vsel %vm381_vm6, %v359_v23, 0.0 }
  0x9d   : > { %v398_v43 = vcombine.low %v384_v41, %v385_v42 }
  0x9f   : > { %v405_v25 = vrot.slane %v398_v43, %v404_v18 }
  0xa1   : > { %v412_v45 = vrot.slane %v405_v25, %v404_v18 }
  0xa3   : > { %v414_v46 = vadd.f32 %v412_v45, %v395_v44 }
  0xa5   : > { %419 = vst.msk [vmem:[%s987_s19] sm:$0x3] %vm983_vm0, %v414_v46 }
  0xa6   : > { %723 = shalt.err (!%p720_p2)
}
  0xa7   : > { %s724_s8 = scalar_lea.hbm %s1030_s27, 32  ;;  %s728_s4 = scalar_lea.hbm %s1084_s2, 64 }
  0xa8   : > { %p725_p9 = scmp.ne.s32.totalorder %s1030_s27, %s724_s8  ;;  %p729_p6 = scmp.lt.u32.totalorder %s1030_s27, %s1084_s2 }
  0xa9   : > { %p730_p13 = scmp.lt.u32.totalorder %s728_s4, %s724_s8  ;;  %p732_p8 = scmp.lt.u32.totalorder %s724_s8, %s1030_s27 }
  0xaa   : > { %p726_p11 = pnand %p725_p9, %p1099_p0 }
  0xab   : > { %p731_p5 = por %p730_p13, %p729_p6 }
  0xac   : > { %p727_p3 = pneg %p726_p11 }
  0xad   : > { %p733_p7 = por %p732_p8, %p731_p5 }
  0xaf   : > { %p734_p4 = pnand %p733_p7, %p727_p3 }
  0xb1   : > { %737 = shalt.err (!%p734_p4)
}
  0xb2   : > { %573 = dma.vmem_to_hbm [thread:$0]  (%p1099_p0), %s1032_s30, 32, %s1030_s27, %s421_s28  }
  0xb3 PF: > { %s448_s29 = sand.u32 1, %s776_s9   ;;  %p1100_p10 = scmp.ne.s32.totalorder %s1090_s24, 0 }
  0xb4   : > { %p1101_p12 = scmp.ge.s32.totalorder %s796_s14, 2  ;;  %s449_s16 = scalar_lea.sflag [#allocation4], %s448_s29 }
  0xb6   : > { %p583_p1 = pnand %p1101_p12, %p1100_p10 }
  0xb8   : > { %771 = dma.done.wait (!%p583_p1), %s449_s16, 32  }
  0xb9   : > { %773 = vsyncadd (!%p583_p1), %s449_s16, 4294967264  ;;  %s21_s14 = sadd.s32 1, %s796_s14   ;;  %s1102_s9 = smov %s780_s10 }
  0xba   : > { %p18_p2 = scmp.ge.s32.totalorder %s21_s14, 4   ;;  %s1103_s10 = smov %s784_s11 }
  0xbb   : > { %s1104_s11 = smov %s875_s23  ;;  %s1105_s12 = smov %s792_s13 }
  0xbc   : > { %s1106_s13 = smov %s1108_s17  ;;  %20 = sbr.rel (!%p18_p2) target bundleno = 8 (0x8), region = 90 }
  0xc3   :  { %454 = vsyncpa [#allocation3], 1 }
  0xc4   :  { %456 = vsyncpa [#allocation3 + $0x1], 1 }
  0xc5   :  { %457 = vsyncpa [#allocation6], 1 }
  0xc6   :  { %459 = vsyncpa [#allocation6 + $0x1], 1 }
  0xc7   :  { %460 = vsyncpa [#allocation4], 1 }
  0xc8   :  { %462 = vsyncpa [#allocation4 + $0x1], 1 }

</bundles_post_ra>
